<compile_context>
chip_gen: v5e
topology: v5e:2x2
jax: 0.10.0
libtpu: 0.0.40
codegen_flags: <defaults>
</compile_context>

<pallas_src>
import functools

import jax
import jax.numpy as jnp
from jax.experimental import pallas as pl
from jax.experimental.pallas import tpu as pltpu


# ----------------------------------------------------------------------------
# Fused kernel: all stacks + batch in one shot.
#   conv1x1 (block-diag matmul) -> softmax(HW) -> DSNT expected coordinates
# ----------------------------------------------------------------------------
def _fused_forward_kernel(x_ref, w_ref, g_ref, hm_ref, c_ref):
    """Single invocation (no grid):

    x_ref : (N*Cin+1, HW)        flattened input, last row = ones (bias absorb)
    w_ref : (R, N*Cin+1)         R = nstack*N*K block-diag weights + bias col
    g_ref : (HW, 128)            [gx, gy, 1, 0, ...] DSNT grid, lane-dense
    hm_ref: (R, HW)              normalized (softmax) heatmaps
    c_ref : (R, 128)             [x, y, 1, 0, ...] per row (sliced in wrapper)
    """
    # All heatmap rows for all stacks & batch elements: one MXU matmul.
    h = jnp.dot(w_ref[...], x_ref[...],
                preferred_element_type=jnp.float32)          # (R, HW)

    # Numerically stable softmax numerator.
    m = jnp.max(h, axis=-1, keepdims=True)                   # (R, 1)
    e = jnp.exp(h - m)                                       # (R, HW)

    # DSNT expectation + softmax denominator fused into one MXU matmul:
    # lane 0 = sum(e*gx), lane 1 = sum(e*gy), lane 2 = sum(e), rest = 0.
    agg = jnp.dot(e, g_ref[...],
                  preferred_element_type=jnp.float32)        # (R, 128)

    inv = 1.0 / agg[:, 2:3]                                  # exact reciprocal

    hm_ref[...] = e * inv                                    # one wide store
    c_ref[...] = agg * inv                                   # one wide store


@functools.partial(jax.jit, static_argnames=("nstack", "n_chans"))
def fused_forward(x, w_full, g_aug, nstack, n_chans):
    """x: (N, Cin, H, W), w_full: (R, N*Cin+1), g_aug: (HW, 128)
    -> (heatmaps (nstack, N, K, H, W), coords (nstack, N, K, 2))."""
    N, Cin, H, W = x.shape
    HW = H * W
    R = nstack * N * n_chans

    x_flat = x.reshape(N * Cin, HW)
    x_aug = jnp.concatenate(
        [x_flat, jnp.ones((1, HW), x_flat.dtype)], axis=0)   # (N*Cin+1, HW)

    hm, c = pl.pallas_call(
        _fused_forward_kernel,
        out_shape=(
            jax.ShapeDtypeStruct((R, HW), jnp.float32),
            jax.ShapeDtypeStruct((R, 128), jnp.float32),
        ),
        in_specs=[
            pl.BlockSpec(memory_space=pltpu.MemorySpace.VMEM),  # x_aug
            pl.BlockSpec(memory_space=pltpu.MemorySpace.VMEM),  # w_full
            pl.BlockSpec(memory_space=pltpu.MemorySpace.VMEM),  # g_aug
        ],
        out_specs=(
            pl.BlockSpec(memory_space=pltpu.MemorySpace.VMEM),
            pl.BlockSpec(memory_space=pltpu.MemorySpace.VMEM),
        ),
    )(x_aug, w_full, g_aug)

    heatmaps = hm.reshape(nstack, N, n_chans, H, W)
    coords = c[:, :2].reshape(nstack, N, n_chans, 2)
    return heatmaps, coords


# ----------------------------------------------------------------------------
# DSNT coordinate grid (Nibali et al.): x_j = (2j - (W-1)) / W, same for y.
# Augmented with a ones column (softmax denominator) and zero-padded to 128
# lanes so the coord output block is lane-dense.
# ----------------------------------------------------------------------------
def dsnt_coord_grid(height, width):
    cols = jnp.arange(width, dtype=jnp.float32)
    rows = jnp.arange(height, dtype=jnp.float32)
    xs = (2.0 * cols - (width - 1)) / width
    ys = (2.0 * rows - (height - 1)) / height
    gx = jnp.tile(xs, height)            # j -> col
    gy = jnp.repeat(ys, width)           # j -> row
    return jnp.stack([gx, gy], axis=-1)  # (HW, 2)


def dsnt_coord_grid_aug(height, width):
    g = dsnt_coord_grid(height, width)                       # (HW, 2)
    ones = jnp.ones((height * width, 1), jnp.float32)
    g3 = jnp.concatenate([g, ones], axis=-1)                 # (HW, 3)
    return jnp.pad(g3, ((0, 0), (0, 128 - 3)))               # (HW, 128)


# ----------------------------------------------------------------------------
# Host-side construction of the block-diagonal weight (done once per N).
#   row = (s*N + n)*K + k ; col = n*Cin + c, plus trailing bias column.
# ----------------------------------------------------------------------------
def build_block_diag_weight(w, b, n_batch):
    nstack, K, Cin = w.shape
    eye = jnp.eye(n_batch, dtype=w.dtype)                       # (N, N)
    wbd = jnp.einsum("skc,nm->snkmc", w, eye)                   # (s,N,K,N,Cin)
    wbd = wbd.reshape(nstack * n_batch * K, n_batch * Cin)
    bias = jnp.broadcast_to(
        b.reshape(nstack, 1, K, 1),
        (nstack, n_batch, K, 1)).reshape(nstack * n_batch * K, 1)
    return jnp.concatenate([wbd, bias], axis=-1)                # (R, N*Cin+1)


# ----------------------------------------------------------------------------
# Python wrapper mirroring HourglassHumanPoseModel (dsnt / softmax config)
# ----------------------------------------------------------------------------
class HourglassHumanPoseModelPallas:
    def __init__(self, n_chans=21, in_chans=4, heatmap_size=16, nstack=2,
                 output_strat="dsnt", preact="softmax"):
        assert output_strat == "dsnt" and preact == "softmax"
        self.n_chans = n_chans
        self.in_chans = in_chans
        self.heatmap_size = heatmap_size
        self.nstack = nstack
        self.output_strat = output_strat
        self.preact = preact
        self.heatmaps_array = []

        # Deterministic stand-in hg parameters (one 1x1 conv head per stack).
        key = jax.random.PRNGKey(42)
        kw, kb = jax.random.split(key)
        self.w = jax.random.normal(
            kw, (nstack, n_chans, in_chans), jnp.float32) * 0.1
        self.b = jax.random.normal(
            kb, (nstack, n_chans, 1), jnp.float32) * 0.01
        self.g_aug = dsnt_coord_grid_aug(heatmap_size, heatmap_size)
        self._w_full_cache = {}   # keyed by batch size

    @property
    def heatmaps(self):
        return self.heatmaps_array[0]

    def _w_full(self, n_batch):
        if n_batch not in self._w_full_cache:
            self._w_full_cache[n_batch] = build_block_diag_weight(
                self.w, self.b, n_batch)
        return self._w_full_cache[n_batch]

    def forward(self, x):
        """x: (N, Cin, H, W) -> list of nstack coord arrays (N, n_chans, 2)."""
        N = x.shape[0]
        hms, coords = fused_forward(
            x, self._w_full(N), self.g_aug, self.nstack, self.n_chans)
        self.heatmaps_array = [hms[s] for s in range(self.nstack)]
        return [coords[s] for s in range(self.nstack)]


# ----------------------------------------------------------------------------
# Pure-JAX reference for numerical checking
# ----------------------------------------------------------------------------
def ref_forward(x, w, b, H, W):
    N = x.shape[0]
    nstack, K, _ = w.shape
    g = dsnt_coord_grid(H, W)
    hms, coords = [], []
    for s in range(nstack):
        hm = jnp.einsum("kc,nchw->nkhw", w[s], x) + b[s].reshape(1, K, 1, 1)
        flat = hm.reshape(N * K, H * W)
        p = jax.nn.softmax(flat, axis=-1)
        c = p @ g
        hms.append(p.reshape(N, K, H, W))
        coords.append(c.reshape(N, K, 2))
    return hms, coords


if __name__ == "__main__":
    N, Cin, H, W = 2, 4, 16, 16
    n_chans, nstack = 21, 2

    key = jax.random.PRNGKey(0)
    x = jax.random.normal(key, (N, Cin, H, W), jnp.float32)

    model = HourglassHumanPoseModelPallas(
        n_chans=n_chans, in_chans=Cin, heatmap_size=H, nstack=nstack,
        output_strat="dsnt", preact="softmax",
    )

    outs = model.forward(x)
    outs = jax.block_until_ready(outs)

    ref_hms, ref_coords = ref_forward(x, model.w, model.b, H, W)
    for s in range(nstack):
        o = outs[s]
        assert o.shape == (N, n_chans, 2), o.shape
        cerr = float(jnp.max(jnp.abs(o - ref_coords[s])))
        herr = float(jnp.max(jnp.abs(model.heatmaps_array[s] - ref_hms[s])))
        assert cerr < 1e-4, cerr
        assert herr < 1e-4, herr

    print("KERNEL_OK")
</pallas_src>

<mosaic_0001>
module attributes {stable_mosaic.version = 11 : i64} {
  func.func @_fused_forward_kernel(%arg0: memref<9x256xf32, #tpu.memory_space<vmem>>, %arg1: memref<84x9xf32, #tpu.memory_space<vmem>>, %arg2: memref<256x128xf32, #tpu.memory_space<vmem>>, %arg3: memref<84x256xf32, #tpu.memory_space<vmem>>, %arg4: memref<84x128xf32, #tpu.memory_space<vmem>>) attributes {dimension_semantics = [], scalar_prefetch = 0 : i64, scratch_operands = 0 : i64, tpu.core_type = #tpu.core_type<tc>} {
    %c0 = arith.constant 0 : index
    %c0_0 = arith.constant 0 : index
    %0 = vector.load %arg1[%c0, %c0_0] : memref<84x9xf32, #tpu.memory_space<vmem>>, vector<84x9xf32>
    %c0_1 = arith.constant 0 : index
    %c0_2 = arith.constant 0 : index
    %1 = vector.load %arg0[%c0_1, %c0_2] : memref<9x256xf32, #tpu.memory_space<vmem>>, vector<9x256xf32>
    %cst = arith.constant dense<0.000000e+00> : vector<84x256xf32>
    %2 = tpu.matmul %0, %1, %cst {dimension_numbers = #tpu.dot_dimension_numbers<[1], [0], [0], [1], [0, 0, 1, 1], [], []>} : vector<84x9xf32>, vector<9x256xf32>, vector<84x256xf32> -> vector<84x256xf32>
    %cst_3 = arith.constant dense<0xFF800000> : vector<84xf32>
    %3 = vector.multi_reduction <maximumf>, %2, %cst_3 [1] : vector<84x256xf32> to vector<84xf32>
    %4 = vector.shape_cast %3 : vector<84xf32> to vector<84x1xf32>
    %5 = vector.broadcast %4 : vector<84x1xf32> to vector<84x256xf32>
    %6 = arith.subf %2, %5 : vector<84x256xf32>
    %7 = math.exp %6 : vector<84x256xf32>
    %c0_4 = arith.constant 0 : index
    %c0_5 = arith.constant 0 : index
    %8 = vector.load %arg2[%c0_4, %c0_5] : memref<256x128xf32, #tpu.memory_space<vmem>>, vector<256x128xf32>
    %cst_6 = arith.constant dense<0.000000e+00> : vector<84x128xf32>
    %9 = tpu.matmul %7, %8, %cst_6 {dimension_numbers = #tpu.dot_dimension_numbers<[1], [0], [0], [1], [0, 0, 1, 1], [], []>} : vector<84x256xf32>, vector<256x128xf32>, vector<84x128xf32> -> vector<84x128xf32>
    %10 = vector.extract_strided_slice %9 {offsets = [0, 2], sizes = [84, 1], strides = [1, 1]} : vector<84x128xf32> to vector<84x1xf32>
    %cst_7 = arith.constant 1.000000e+00 : f32
    %11 = vector.broadcast %cst_7 : f32 to vector<84x1xf32>
    %12 = arith.divf %11, %10 : vector<84x1xf32>
    %13 = vector.broadcast %12 : vector<84x1xf32> to vector<84x256xf32>
    %14 = arith.mulf %7, %13 : vector<84x256xf32>
    %c0_8 = arith.constant 0 : index
    %c0_9 = arith.constant 0 : index
    %15 = vector.load %arg3[%c0_8, %c0_9] : memref<84x256xf32, #tpu.memory_space<vmem>>, vector<84x256xf32>
    tpu.vector_store %arg3[%c0_8, %c0_9], %14 {strides = array<i32>} : memref<84x256xf32, #tpu.memory_space<vmem>>, vector<84x256xf32>,
    %16 = vector.broadcast %12 : vector<84x1xf32> to vector<84x128xf32>
    %17 = arith.mulf %9, %16 : vector<84x128xf32>
    %c0_10 = arith.constant 0 : index
    %c0_11 = arith.constant 0 : index
    %18 = vector.load %arg4[%c0_10, %c0_11] : memref<84x128xf32, #tpu.memory_space<vmem>>, vector<84x128xf32>
    tpu.vector_store %arg4[%c0_10, %c0_11], %17 {strides = array<i32>} : memref<84x128xf32, #tpu.memory_space<vmem>>, vector<84x128xf32>,
    return
  }
}

</mosaic_0001>

<bundles_post_ra>
// kernel: fused_forward.1
= control target key start
LH: loop header
LB: loop body
LE: loop exit
PB: predicated region body
PF: predicated region fallthrough
CT: control target
= control target key end

     0   :  { %10 = vsyncpa [#allocation3], 0  ;;  %s872_s18 = smov [#allocation2]   ;;  %s873_s20 = smov 128   ;;  %s1349_s0 = inlined_call_operand.vmem [shape: f32[9,256], index: 0, kind: input, shape index: {}]   ;;  %s1350_s1 = inlined_call_operand.vmem [shape: f32[84,9], index: 1, kind: input, shape index: {}]   ;;  %s1351_s2 = inlined_call_operand.hbm [shape: f32[256,128], index: 2, kind: input, shape index: {}]   ;;  %s1352_s3 = inlined_call_operand.vmem [shape: f32[84,256], index: 3, kind: output, shape index: {0}]   ;;  %s1353_s4 = inlined_call_operand.vmem [shape: f32[84,128], index: 4, kind: output, shape index: {1}]  }
   0x1   :  { %s19_s17 = sshll.u32 %s1351_s2, 4  ;;  %s21_s19 = sshll.u32 %s872_s18, 4  ;;  %s20_s17 = int_to_ptr.hbm [resolvable:$true] %s19_s17  ;;  %s22_s19 = int_to_ptr.vmem [resolvable:$true] %s21_s19 }
   0x2   :  { %s874_s21 = smov 8  }
   0x3   :  { %27 = dma.hbm_to_vmem [thread:$0]  %s20_s17, 4096, %s22_s19, [#allocation3], %s873_s20, %s873_s20, %s874_s21  }
   0x4   :  { %870 = dma.done.wait [#allocation3], 4096  }
   0x5   :  { %871 = vsyncadd [#allocation3], 4294963200  ;;  %vm81_vm0 = vcmask 1040384   ;;  %v45_v0 = vld [vmem:[%s1349_s0 + $0x10] sm:$0x1]  ;;  %v43_v2 = vld [vmem:[%s1349_s0] sm:$0xff] }
   0x6   :  { %v46_v1 = vld [vmem:[%s1349_s0 + $0x18] sm:$0x1]  ;;  %717 = vmatpush.msk.msra.mxu0 %vm81_vm0, %v45_v0  ;;  %v44_v3 = vld [vmem:[%s1349_s0 + $0x8] sm:$0xff]  ;;  %v32_v4 = vld [vmem:[%s1350_s1] sm:$0xff]  ;;  %vm47_vm1 = vcmask 72704   ;;  %vm218_vm2 = vcmask 1043456  }
   0x7   :  { %729 = vmatpush.msk.msra.mxu1 %vm81_vm0, %v46_v1  ;;  %v33_v5 = vld [vmem:[%s1350_s1 + $0x8] sm:$0xff]  ;;  %v34_v6 = vld [vmem:[%s1350_s1 + $0x10] sm:$0xff]  ;;  %v35_v7 = vld [vmem:[%s1350_s1 + $0x18] sm:$0xff] }
   0x8   :  { %103 = vmatpush.msra.mxu0 %v43_v2  ;;  %v36_v8 = vld [vmem:[%s1350_s1 + $0x20] sm:$0xff]  ;;  %v37_v9 = vld [vmem:[%s1350_s1 + $0x28] sm:$0xff]  ;;  %v38_v10 = vld [vmem:[%s1350_s1 + $0x30] sm:$0xff] }
   0x9   :  { %153 = vmatpush.msra.mxu1 %v44_v3  ;;  %718 = vmatmul.msk.f32.vlgmr.msra.gmra.mxu0 %vm47_vm1, %v32_v4  ;;  %v39_v11 = vld [vmem:[%s1350_s1 + $0x38] sm:$0xff]  ;;  %v40_v12 = vld [vmem:[%s1350_s1 + $0x40] sm:$0xff]  ;;  %v41_v13 = vld [vmem:[%s1350_s1 + $0x48] sm:$0xff] }
   0xa   :  { %730 = vmatmul.msk.f32.vlgmr.msra.gmra.mxu1 %vm47_vm1, %v32_v4  ;;  %v42_v14 = vld [vmem:[%s1350_s1 + $0x50] sm:$0xf]  ;;  %v305_v35 = vld [vmem:[#allocation2 + $0x78] sm:$0xff]  ;;  %v303_v39 = vld [vmem:[#allocation2 + $0x68] sm:$0xff] }
   0xb   :  { %v321_v36 = vld [vmem:[#allocation2 + $0xf8] sm:$0xff]  ;;  %v304_v37 = vld [vmem:[#allocation2 + $0x70] sm:$0xff]  ;;  %741 = vmatpush.msra.mxu2 %v305_v35  ;;  %v319_v40 = vld [vmem:[#allocation2 + $0xe8] sm:$0xff]  ;;  %322 = vmatpush.msrb.mxu0 %v305_v35 }
   0xc   :  { %757 = vmatpush.msra.mxu3 %v321_v36  ;;  %v320_v38 = vld [vmem:[#allocation2 + $0xf0] sm:$0xff]  ;;  %372 = vmatpush.msrb.mxu1 %v321_v36  ;;  %v302_v43 = vld [vmem:[#allocation2 + $0x60] sm:$0xff]  ;;  %v301_v46 = vld [vmem:[#allocation2 + $0x58] sm:$0xff] }
   0xd   :  { %742 = vmatpush.msra.mxu2 %v304_v37  ;;  %323 = vmatpush.msrb.mxu0 %v304_v37  ;;  %v318_v45 = vld [vmem:[#allocation2 + $0xe0] sm:$0xff]  ;;  %v317_v47 = vld [vmem:[#allocation2 + $0xd8] sm:$0xff]  ;;  %v300_v48 = vld [vmem:[#allocation2 + $0x50] sm:$0xff] }
   0xe   :  { %758 = vmatpush.msra.mxu3 %v320_v38  ;;  %373 = vmatpush.msrb.mxu1 %v320_v38  ;;  %v316_v49 = vld [vmem:[#allocation2 + $0xd0] sm:$0xff]  ;;  %v299_v50 = vld [vmem:[#allocation2 + $0x48] sm:$0xff]  ;;  %v298_v54 = vld [vmem:[#allocation2 + $0x40] sm:$0xff] }
   0xf   :  { %743 = vmatpush.msra.mxu2 %v303_v39  ;;  %324 = vmatpush.msrb.mxu0 %v303_v39  ;;  %v315_v51 = vld [vmem:[#allocation2 + $0xc8] sm:$0xff]  ;;  %v314_v56 = vld [vmem:[#allocation2 + $0xc0] sm:$0xff]  ;;  %v297_v57 = vld [vmem:[#allocation2 + $0x38] sm:$0xff] }
  0x10   :  { %759 = vmatpush.msra.mxu3 %v319_v40  ;;  %374 = vmatpush.msrb.mxu1 %v319_v40  ;;  %v313_v58 = vld [vmem:[#allocation2 + $0xb8] sm:$0xff]  ;;  %v296_v59 = vld [vmem:[#allocation2 + $0x30] sm:$0xff] }
  0x11   :  { %719 = vmatmul.msk.f32.gmra.mxu0 %vm47_vm1, %v33_v5  ;;  %744 = vmatpush.msra.mxu2 %v302_v43  ;;  %v312_v60 = vld [vmem:[#allocation2 + $0xb0] sm:$0xff] }
  0x12   :  { %731 = vmatmul.msk.f32.gmra.mxu1 %vm47_vm1, %v33_v5  ;;  %760 = vmatpush.msra.mxu3 %v318_v45 }
  0x13   :  { %325 = vmatpush.msrb.mxu0 %v302_v43  ;;  %745 = vmatpush.msra.mxu2 %v301_v46 }
  0x14   :  { %375 = vmatpush.msrb.mxu1 %v318_v45  ;;  %761 = vmatpush.msra.mxu3 %v317_v47 }
  0x15   :  { %326 = vmatpush.msrb.mxu0 %v301_v46  ;;  %746 = vmatpush.msra.mxu2 %v300_v48 }
  0x16   :  { %376 = vmatpush.msrb.mxu1 %v317_v47  ;;  %762 = vmatpush.msra.mxu3 %v316_v49 }
  0x17   :  { %327 = vmatpush.msrb.mxu0 %v300_v48  ;;  %747 = vmatpush.msra.mxu2 %v299_v50 }
  0x18   :  { %377 = vmatpush.msrb.mxu1 %v316_v49  ;;  %763 = vmatpush.msra.mxu3 %v315_v51 }
  0x19   :  { %720 = vmatmul.msk.f32.gmra.mxu0 %vm47_vm1, %v34_v6  ;;  %748 = vmatpush.msra.mxu2 %v298_v54 }
  0x1a   :  { %732 = vmatmul.msk.f32.gmra.mxu1 %vm47_vm1, %v34_v6  ;;  %328 = vmatpush.msrb.mxu0 %v299_v50  ;;  %v295_v6 = vld [vmem:[#allocation2 + $0x28] sm:$0xff] }
  0x1b   :  { %764 = vmatpush.msra.mxu3 %v314_v56  ;;  %378 = vmatpush.msrb.mxu1 %v315_v51 }
  0x1c   :  { %749 = vmatpush.msra.mxu2 %v297_v57  ;;  %329 = vmatpush.msrb.mxu0 %v298_v54 }
  0x1d   :  { %765 = vmatpush.msra.mxu3 %v313_v58  ;;  %379 = vmatpush.msrb.mxu1 %v314_v56 }
  0x1e   :  { %750 = vmatpush.msra.mxu2 %v296_v59  ;;  %330 = vmatpush.msrb.mxu0 %v297_v57 }
  0x1f   :  { %766 = vmatpush.msra.mxu3 %v312_v60  ;;  %380 = vmatpush.msrb.mxu1 %v313_v58 }
  0x20   :  { %331 = vmatpush.msrb.mxu0 %v296_v59  ;;  %751 = vmatpush.msra.mxu2 %v295_v6 }
  0x21   :  { %721 = vmatmul.msk.f32.gmra.mxu0 %vm47_vm1, %v35_v7  ;;  %381 = vmatpush.msrb.mxu1 %v312_v60 }
  0x22   :  { %733 = vmatmul.msk.f32.gmra.mxu1 %vm47_vm1, %v35_v7  ;;  %v311_v7 = vld [vmem:[#allocation2 + $0xa8] sm:$0xff]  ;;  %332 = vmatpush.msrb.mxu0 %v295_v6 }
  0x23   :  { %767 = vmatpush.msra.mxu3 %v311_v7  ;;  %382 = vmatpush.msrb.mxu1 %v311_v7 }
  0x29   :  { %722 = vmatmul.msk.f32.gmra.mxu0 %vm47_vm1, %v36_v8 }
  0x2a   :  { %734 = vmatmul.msk.f32.gmra.mxu1 %vm47_vm1, %v36_v8  ;;  %v294_v8 = vld [vmem:[#allocation2 + $0x20] sm:$0xff] }
  0x2b   :  { %752 = vmatpush.msra.mxu2 %v294_v8  ;;  %333 = vmatpush.msrb.mxu0 %v294_v8 }
  0x31   :  { %723 = vmatmul.msk.f32.gmra.mxu0 %vm47_vm1, %v37_v9 }
  0x32   :  { %735 = vmatmul.msk.f32.gmra.mxu1 %vm47_vm1, %v37_v9  ;;  %v310_v9 = vld [vmem:[#allocation2 + $0xa0] sm:$0xff] }
  0x33   :  { %768 = vmatpush.msra.mxu3 %v310_v9  ;;  %383 = vmatpush.msrb.mxu1 %v310_v9 }
  0x39   :  { %724 = vmatmul.msk.f32.gmra.mxu0 %vm47_vm1, %v38_v10 }
  0x3a   :  { %736 = vmatmul.msk.f32.gmra.mxu1 %vm47_vm1, %v38_v10  ;;  %v293_v10 = vld [vmem:[#allocation2 + $0x18] sm:$0xff] }
  0x3b   :  { %753 = vmatpush.msra.mxu2 %v293_v10  ;;  %334 = vmatpush.msrb.mxu0 %v293_v10 }
  0x41   :  { %725 = vmatmul.msk.f32.gmra.mxu0 %vm47_vm1, %v39_v11 }
  0x42   :  { %737 = vmatmul.msk.f32.gmra.mxu1 %vm47_vm1, %v39_v11  ;;  %v309_v11 = vld [vmem:[#allocation2 + $0x98] sm:$0xff] }
  0x43   :  { %769 = vmatpush.msra.mxu3 %v309_v11  ;;  %384 = vmatpush.msrb.mxu1 %v309_v11 }
  0x49   :  { %726 = vmatmul.msk.f32.gmra.mxu0 %vm47_vm1, %v40_v12 }
  0x4a   :  { %738 = vmatmul.msk.f32.gmra.mxu1 %vm47_vm1, %v40_v12  ;;  %v292_v12 = vld [vmem:[#allocation2 + $0x10] sm:$0xff] }
  0x4b   :  { %754 = vmatpush.msra.mxu2 %v292_v12  ;;  %335 = vmatpush.msrb.mxu0 %v292_v12 }
  0x51   :  { %727 = vmatmul.msk.f32.gmra.mxu0 %vm47_vm1, %v41_v13 }
  0x52   :  { %739 = vmatmul.msk.f32.gmra.mxu1 %vm47_vm1, %v41_v13  ;;  %v308_v13 = vld [vmem:[#allocation2 + $0x90] sm:$0xff] }
  0x53   :  { %770 = vmatpush.msra.mxu3 %v308_v13  ;;  %385 = vmatpush.msrb.mxu1 %v308_v13 }
  0x59   :  { %728 = vmatmul.msk.f32.gmra.mxu0 %vm47_vm1, %v42_v14 }
  0x5a   :  { %740 = vmatmul.msk.f32.gmra.mxu1 %vm47_vm1, %v42_v14  ;;  %v291_v14 = vld [vmem:[#allocation2 + $0x8] sm:$0xff] }
  0x5b   :  { %755 = vmatpush.msra.mxu2 %v291_v14  ;;  %336 = vmatpush.msrb.mxu0 %v291_v14 }
  0x86   :  { %v971_v15 = vpop.f32.mrf.mxu0 }
  0x87   :  { %v973_v16 = vpop.f32.mrf.mxu1 }
  0x88   :  { %v188_v63 = vmax.f32 %v971_v15, %v973_v16 }
  0x8e   :  { %v975_v17 = vpop.f32.mrf.mxu0 }
  0x8f   :  { %v977_v18 = vpop.f32.mrf.mxu1 }
  0x90   :  { %v191_v19 = vmax.f32 %v975_v17, %v977_v18 }
  0x92   :  { %192 = vmax.xlane.f32.xlu0 %v191_v19  ;;  %v307_v19 = vld [vmem:[#allocation2 + $0x88] sm:$0xff] }
  0x93   :  { %771 = vmatpush.msra.mxu3 %v307_v19  ;;  %386 = vmatpush.msrb.mxu1 %v307_v19 }
  0x96   :  { %v981_v20 = vpop.f32.mrf.mxu0 }
  0x97   :  { %v983_v21 = vpop.f32.mrf.mxu1 }
  0x98   :  { %v194_v22 = vmax.f32 %v981_v20, %v983_v21 }
  0x9a   :  { %195 = vmax.xlane.f32.xlu0 %v194_v22  ;;  %v290_v22 = vld [vmem:[#allocation2] sm:$0xff] }
  0x9b   :  { %756 = vmatpush.msra.mxu2 %v290_v22  ;;  %337 = vmatpush.msrb.mxu0 %v290_v22 }
  0x9e   :  { %v987_v23 = vpop.f32.mrf.mxu0 }
  0x9f   :  { %v989_v24 = vpop.f32.mrf.mxu1 }
  0xa0   :  { %v197_v25 = vmax.f32 %v987_v23, %v989_v24 }
  0xa2   :  { %198 = vmax.xlane.f32.xlu1 %v197_v25  ;;  %v306_v25 = vld [vmem:[#allocation2 + $0x80] sm:$0xff] }
  0xa3   :  { %772 = vmatpush.msra.mxu3 %v306_v25  ;;  %387 = vmatpush.msrb.mxu1 %v306_v25 }
  0xa6   :  { %v993_v26 = vpop.f32.mrf.mxu0 }
  0xa7   :  { %v995_v27 = vpop.f32.mrf.mxu1 }
  0xa8   :  { %v200_v28 = vmax.f32 %v993_v26, %v995_v27 }
  0xaa   :  { %201 = vmax.xlane.f32.xlu1 %v200_v28 }
  0xae   :  { %v999_v29 = vpop.f32.mrf.mxu0 }
  0xaf   :  { %v1001_v30 = vpop.f32.mrf.mxu1 }
  0xb0   :  { %v203_v31 = vmax.f32 %v999_v29, %v1001_v30 }
  0xb2   :  { %204 = vmax.xlane.f32.xlu2 %v203_v31 }
  0xb6   :  { %v1005_v32 = vpop.f32.mrf.mxu0 }
  0xb7   :  { %v1007_v33 = vpop.f32.mrf.mxu1 }
  0xb8   :  { %v206_v34 = vmax.f32 %v1005_v32, %v1007_v33 }
  0xba   :  { %207 = vmax.xlane.f32.xlu2 %v206_v34 }
  0xbe   :  { %v1011_v41 = vpop.f32.mrf.mxu0 }
  0xbf   :  { %v1013_v42 = vpop.f32.mrf.mxu1 }
  0xc0   :  { %v209_v44 = vmax.f32 %v1011_v41, %v1013_v42 }
  0xc2   :  { %210 = vmax.xlane.f32.xlu0 %v209_v44 }
  0xc6   :  { %v1017_v52 = vpop.f32.mrf.mxu0 }
  0xc7   :  { %v1019_v53 = vpop.f32.mrf.mxu1 }
  0xc8   :  { %v212_v55 = vmax.f32 %v1017_v52, %v1019_v53 }
  0xca   :  { %213 = vmax.xlane.f32.xlu1 %v212_v55 }
  0xce   :  { %v1023_v61 = vpop.f32.mrf.mxu0 }
  0xcf   :  { %v1025_v62 = vpop.f32.mrf.mxu1 }
  0xd0   :  { %v215_v0 = vmax.f32 %v1023_v61, %v1025_v62 }
  0xd2   :  { %189 = vmax.xlane.f32.xlu1 %v188_v63  ;;  %216 = vmax.xlane.f32.xlu2 %v215_v0 }
  0xd6   :  { %v1031_v1 = vpop.f32.mrf.mxu0 }
  0xd7   :  { %v1033_v2 = vpop.f32.mrf.mxu1  ;;  %v219_v3 = vsel %vm218_vm2, %v1031_v1, -inf }
  0xd8   :  { %v220_v4 = vsel %vm218_vm2, %v1033_v2, -inf }
  0xd9   :  { %v221_v5 = vmax.f32 %v219_v3, %v220_v4 }
  0xdb   :  { %222 = vmax.xlane.f32.xlu0 %v221_v5 }
 0x105   :  { %v193_v28 = vpop.xlane.xlu0 %192 }
 0x106   :  { %v226_v31 = vsub.f32 %v975_v17, %v193_v28  ;;  %v227_v34 = vsub.f32 %v977_v18, %v193_v28 }
 0x108   :  { %v250_v35 = vmul.f32 1.442695, %v226_v31  ;;  %v252_v36 = vmul.f32 1.442695, %v227_v34 }
 0x10a   :  { %780 = vpow2.f32 %v250_v35 }
 0x10b   :  { %782 = vpow2.f32 %v252_v36 }
 0x10d   :  { %v196_v37 = vpop.xlane.xlu0 %195 }
 0x10e   :  { %v228_v38 = vsub.f32 %v981_v20, %v196_v37  ;;  %v229_v39 = vsub.f32 %v983_v21, %v196_v37 }
 0x110   :  { %v1041_v40 = vpop.eup %780  ;;  %v254_v43 = vmul.f32 1.442695, %v228_v38  ;;  %v256_v44 = vmul.f32 1.442695, %v229_v39 }
 0x111   :  { %v1043_v45 = vpop.eup %782  ;;  %341 = vmatmul.f32.vlgmr.msra.gmra.mxu2 %v1041_v40 }
 0x112   :  { %784 = vpow2.f32 %v254_v43  ;;  %391 = vmatmul.f32.vlgmr.msra.gmra.mxu3 %v1043_v45 }
 0x113   :  { %786 = vpow2.f32 %v256_v44 }
 0x115   :  { %v199_v17 = vpop.xlane.xlu1 %198 }
 0x116   :  { %v230_v18 = vsub.f32 %v987_v23, %v199_v17  ;;  %v231_v46 = vsub.f32 %v989_v24, %v199_v17 }
 0x118   :  { %v1049_v20 = vpop.eup %784  ;;  %v258_v21 = vmul.f32 1.442695, %v230_v18  ;;  %v260_v47 = vmul.f32 1.442695, %v231_v46 }
 0x119   :  { %v1051_v48 = vpop.eup %786  ;;  %344 = vmatmul.f32.gmra.mxu2 %v1049_v20 }
 0x11a   :  { %788 = vpow2.f32 %v258_v21  ;;  %394 = vmatmul.f32.gmra.mxu3 %v1051_v48  ;;  %v875_v21 = vmov 2  }
 0x11b   :  { %790 = vpow2.f32 %v260_v47  ;;  %778 = vset.pattern.permute.xlu0 %v875_v21  ;;  %779 = vset.pattern.permute.xlu1 %v875_v21 }
 0x11c   :  { %777 = vset.pattern.permute.xlu2 %v875_v21 }
 0x11d   :  { %v202_v49 = vpop.xlane.xlu1 %201 }
 0x11e   :  { %v232_v50 = vsub.f32 %v993_v26, %v202_v49  ;;  %v233_v51 = vsub.f32 %v995_v27, %v202_v49 }
 0x120   :  { %v1057_v23 = vpop.eup %788  ;;  %v262_v24 = vmul.f32 1.442695, %v232_v50  ;;  %v264_v54 = vmul.f32 1.442695, %v233_v51 }
 0x121   :  { %v1059_v55 = vpop.eup %790  ;;  %347 = vmatmul.f32.gmra.mxu2 %v1057_v23 }
 0x122   :  { %792 = vpow2.f32 %v262_v24  ;;  %397 = vmatmul.f32.gmra.mxu3 %v1059_v55 }
 0x123   :  { %794 = vpow2.f32 %v264_v54 }
 0x125   :  { %v205_v56 = vpop.xlane.xlu2 %204 }
 0x126   :  { %v234_v57 = vsub.f32 %v999_v29, %v205_v56  ;;  %v235_v58 = vsub.f32 %v1001_v30, %v205_v56 }
 0x128   :  { %v1065_v26 = vpop.eup %792  ;;  %v266_v27 = vmul.f32 1.442695, %v234_v57  ;;  %v268_v59 = vmul.f32 1.442695, %v235_v58 }
 0x129   :  { %v1067_v60 = vpop.eup %794  ;;  %350 = vmatmul.f32.gmra.mxu2 %v1065_v26 }
 0x12a   :  { %796 = vpow2.f32 %v266_v27  ;;  %400 = vmatmul.f32.gmra.mxu3 %v1067_v60 }
 0x12b   :  { %798 = vpow2.f32 %v268_v59 }
 0x12d   :  { %v208_v63 = vpop.xlane.xlu2 %207 }
 0x12e   :  { %v236_v0 = vsub.f32 %v1005_v32, %v208_v63  ;;  %v237_v3 = vsub.f32 %v1007_v33, %v208_v63 }
 0x130   :  { %v1073_v29 = vpop.eup %796  ;;  %v270_v30 = vmul.f32 1.442695, %v236_v0  ;;  %v272_v4 = vmul.f32 1.442695, %v237_v3 }
 0x131   :  { %v1075_v5 = vpop.eup %798  ;;  %353 = vmatmul.f32.gmra.mxu2 %v1073_v29 }
 0x132   :  { %800 = vpow2.f32 %v270_v30  ;;  %403 = vmatmul.f32.gmra.mxu3 %v1075_v5 }
 0x133   :  { %802 = vpow2.f32 %v272_v4 }
 0x135   :  { %v211_v6 = vpop.xlane.xlu0 %210 }
 0x136   :  { %v238_v7 = vsub.f32 %v1011_v41, %v211_v6  ;;  %v239_v8 = vsub.f32 %v1013_v42, %v211_v6 }
 0x138   :  { %v1081_v32 = vpop.eup %800  ;;  %v274_v33 = vmul.f32 1.442695, %v238_v7  ;;  %v276_v9 = vmul.f32 1.442695, %v239_v8 }
 0x139   :  { %v1083_v10 = vpop.eup %802  ;;  %356 = vmatmul.f32.gmra.mxu2 %v1081_v32 }
 0x13a   :  { %804 = vpow2.f32 %v274_v33  ;;  %406 = vmatmul.f32.gmra.mxu3 %v1083_v10 }
 0x13b   :  { %806 = vpow2.f32 %v276_v9 }
 0x13d   :  { %v214_v11 = vpop.xlane.xlu1 %213 }
 0x13e   :  { %v240_v12 = vsub.f32 %v1017_v52, %v214_v11  ;;  %v241_v13 = vsub.f32 %v1019_v53, %v214_v11 }
 0x140   :  { %v1089_v41 = vpop.eup %804  ;;  %v278_v42 = vmul.f32 1.442695, %v240_v12  ;;  %v280_v14 = vmul.f32 1.442695, %v241_v13 }
 0x141   :  { %v1091_v19 = vpop.eup %806  ;;  %359 = vmatmul.f32.gmra.mxu2 %v1089_v41 }
 0x142   :  { %808 = vpow2.f32 %v278_v42  ;;  %409 = vmatmul.f32.gmra.mxu3 %v1091_v19 }
 0x143   :  { %810 = vpow2.f32 %v280_v14 }
 0x145   :  { %v190_v22 = vpop.xlane.xlu1 %189  ;;  %v217_v25 = vpop.xlane.xlu2 %216 }
 0x146   :  { %v224_v28 = vsub.f32 %v971_v15, %v190_v22  ;;  %v225_v52 = vsub.f32 %v973_v16, %v190_v22  ;;  %v242_v53 = vsub.f32 %v1023_v61, %v217_v25  ;;  %v243_v31 = vsub.f32 %v1025_v62, %v217_v25 }
 0x148   :  { %v1099_v34 = vpop.eup %808  ;;  %v246_v35 = vmul.f32 1.442695, %v224_v28  ;;  %v248_v36 = vmul.f32 1.442695, %v225_v52  ;;  %v282_v37 = vmul.f32 1.442695, %v242_v53 }
 0x149   :  { %v1101_v38 = vpop.eup %810  ;;  %v284_v39 = vmul.f32 1.442695, %v243_v31  ;;  %362 = vmatmul.f32.gmra.mxu2 %v1099_v34 }
 0x14a   :  { %812 = vpow2.f32 %v246_v35  ;;  %412 = vmatmul.f32.gmra.mxu3 %v1101_v38 }
 0x14b   :  { %814 = vpow2.f32 %v248_v36 }
 0x14c   :  { %816 = vpow2.f32 %v282_v37 }
 0x14d   :  { %818 = vpow2.f32 %v284_v39 }
 0x14e   :  { %v223_v15 = vpop.xlane.xlu0 %222 }
 0x14f   :  { %v244_v16 = vsub.f32 %v1031_v1, %v223_v15  ;;  %v245_v61 = vsub.f32 %v1033_v2, %v223_v15 }
 0x150   :  { %v1107_v62 = vpop.eup %812 }
 0x151   :  { %v1109_v43 = vpop.eup %814  ;;  %v286_v44 = vmul.f32 1.442695, %v244_v16  ;;  %v288_v17 = vmul.f32 1.442695, %v245_v61  ;;  %338 = vmatmul.f32.vlgmr.msrb.gmra.mxu0 %v1107_v62 }
 0x152   :  { %v1112_v18 = vpop.eup %816  ;;  %388 = vmatmul.f32.vlgmr.msrb.gmra.mxu1 %v1109_v43 }
 0x153   :  { %v1115_v46 = vpop.eup %818  ;;  %820 = vpow2.f32 %v286_v44  ;;  %365 = vmatmul.f32.gmra.mxu2 %v1112_v18 }
 0x154   :  { %822 = vpow2.f32 %v288_v17  ;;  %415 = vmatmul.f32.gmra.mxu3 %v1115_v46 }
 0x159   :  { %v1119_v1 = vpop.eup %820 }
 0x15a   :  { %v1121_v2 = vpop.eup %822 }
 0x15b   :  { %368 = vmatmul.f32.gmra.mxu2 %v1119_v1 }
 0x15c   :  { %418 = vmatmul.f32.gmra.mxu3 %v1121_v2 }
 0x194   :  { %v342_v47 = vpop.f32.mrf.mxu2 }
 0x195   :  { %v392_v49 = vpop.f32.mrf.mxu3 }
 0x196   :  { %v1125_v50 = vadd.f32 %v392_v49, %v342_v47 }
 0x198   :  { %824 = vrcp.f32 %v1125_v50  ;;  %v448_v27 = vand.u32 2147483648, %v1125_v50  ;;  %v446_v63 = vand.u32 2147483647, %v1125_v50  ;;  %vm442_vm4 = vweird.f32 %v1125_v50 }
 0x19a   :  { %v449_v6 = vor.u32 1.1754944e-38, %v448_v27  ;;  %vm447_vm6 = vcmp.eq.f32.partialorder %v446_v63, 8.507059e+37 }
 0x19c   :  { %v345_v51 = vpop.f32.mrf.mxu2 }
 0x19d   :  { %v395_v24 = vpop.f32.mrf.mxu3 }
 0x19e   :  { %v825_v54 = vpop.eup %824  ;;  %v1128_v56 = vadd.f32 %v395_v24, %v345_v51 }
 0x19f   :  { %v438_v57 = vmul.f32 %v825_v54, %v1125_v50  ;;  %vm443_vm3 = vweird.f32 %v825_v54 }
 0x1a0   :  { %826 = vrcp.f32 %v1128_v56  ;;  %vm444_vm5 = vmor %vm442_vm4, %vm443_vm3  ;;  %v463_v11 = vand.u32 2147483648, %v1128_v56  ;;  %v461_v13 = vand.u32 2147483647, %v1128_v56  ;;  %vm457_vm8 = vweird.f32 %v1128_v56 }
 0x1a1   :  { %v439_v58 = vsub.f32 1.0, %v438_v57 }
 0x1a2   :  { %v464_v25 = vor.u32 1.1754944e-38, %v463_v11  ;;  %vm462_vm10 = vcmp.eq.f32.partialorder %v461_v13, 8.507059e+37 }
 0x1a3   :  { %v440_v59 = vmul.f32 %v825_v54, %v439_v58 }
 0x1a4   :  { %v348_v0 = vpop.f32.mrf.mxu2 }
 0x1a5   :  { %v398_v3 = vpop.f32.mrf.mxu3  ;;  %v441_v30 = vadd.f32 %v825_v54, %v440_v59 }
 0x1a6   :  { %v827_v4 = vpop.eup %826  ;;  %v1149_v58 = vadd.f32 %v398_v3, %v348_v0 }
 0x1a7   :  { %v445_v7 = vsel %vm444_vm5, %v825_v54, %v441_v30  ;;  %v453_v8 = vmul.f32 %v827_v4, %v1128_v56  ;;  %vm458_vm7 = vweird.f32 %v827_v4 }
 0x1a8   :  { %v450_v33 = vsel %vm447_vm6, %v449_v6, %v445_v7  ;;  %vm459_vm9 = vmor %vm457_vm8, %vm458_vm7 }
 0x1a9   :  { %594 = vperm.xlu0 %778, %v450_v33   ;;  %v454_v9 = vsub.f32 1.0, %v453_v8 }
 0x1ab   :  { %v455_v12 = vmul.f32 %v827_v4, %v454_v9 }
 0x1ac   :  { %v351_v42 = vpop.f32.mrf.mxu2 }
 0x1ad   :  { %v401_v14 = vpop.f32.mrf.mxu3  ;;  %v456_v22 = vadd.f32 %v827_v4, %v455_v12 }
 0x1ae   :  { %v1158_v33 = vadd.f32 %v401_v14, %v351_v42 }
 0x1af   :  { %v460_v28 = vsel %vm459_vm9, %v827_v4, %v456_v22 }
 0x1b0   :  { %v465_v52 = vsel %vm462_vm10, %v464_v25, %v460_v28 }
 0x1b1   :  { %599 = vperm.xlu1 %779, %v465_v52  }
 0x1b4   :  { %v354_v53 = vpop.f32.mrf.mxu2 }
 0x1b5   :  { %v404_v31 = vpop.f32.mrf.mxu3 }
 0x1b6   :  { %v1139_v35 = vadd.f32 %v404_v31, %v354_v53 }
 0x1b8   :  { %828 = vrcp.f32 %v1139_v35  ;;  %v508_v61 = vand.u32 2147483648, %v1139_v35  ;;  %v506_v17 = vand.u32 2147483647, %v1139_v35  ;;  %vm502_vm12 = vweird.f32 %v1139_v35 }
 0x1ba   :  { %v509_v24 = vor.u32 1.1754944e-38, %v508_v61  ;;  %vm507_vm14 = vcmp.eq.f32.partialorder %v506_v17, 8.507059e+37 }
 0x1bc   :  { %v357_v36 = vpop.f32.mrf.mxu2 }
 0x1bd   :  { %v407_v37 = vpop.f32.mrf.mxu3 }
 0x1be   :  { %v829_v39 = vpop.eup %828  ;;  %v1171_v61 = vadd.f32 %v407_v37, %v357_v36 }
 0x1bf   :  { %v498_v15 = vmul.f32 %v829_v39, %v1139_v35  ;;  %vm503_vm11 = vweird.f32 %v829_v39 }
 0x1c0   :  { %vm504_vm13 = vmor %vm502_vm12, %vm503_vm11  ;;  %vm472_vm12 = vweird.f32 %v1149_v58 }
 0x1c1   :  { %v499_v16 = vsub.f32 1.0, %v498_v15 }
 0x1c3   :  { %v500_v44 = vmul.f32 %v829_v39, %v499_v16 }
 0x1c4   :  { %v360_v21 = vpop.f32.mrf.mxu2 }
 0x1c5   :  { %v410_v47 = vpop.f32.mrf.mxu3  ;;  %v501_v49 = vadd.f32 %v829_v39, %v500_v44 }
 0x1c6   :  { %v1146_v51 = vadd.f32 %v410_v47, %v360_v21 }
 0x1c7   :  { %v505_v54 = vsel %vm504_vm13, %v829_v39, %v501_v49 }
 0x1c8   :  { %830 = vrcp.f32 %v1146_v51  ;;  %v510_v57 = vsel %vm507_vm14, %v509_v24, %v505_v54  ;;  %v538_v3 = vand.u32 2147483648, %v1146_v51  ;;  %v536_v12 = vand.u32 2147483647, %v1146_v51 }
 0x1c9   :  { %614 = vperm.xlu1 %779, %v510_v57   ;;  %832 = vrcp.f32 %v1149_v58  ;;  %vm532_vm0 = vweird.f32 %v1146_v51 }
 0x1ca   :  { %v539_v42 = vor.u32 1.1754944e-38, %v538_v3  ;;  %vm537_vm2 = vcmp.eq.f32.partialorder %v536_v12, 8.507059e+37 }
 0x1cc   :  { %v363_v27 = vpop.f32.mrf.mxu2 }
 0x1cd   :  { %v413_v59 = vpop.f32.mrf.mxu3 }
 0x1ce   :  { %v831_v63 = vpop.eup %830  ;;  %v1152_v30 = vadd.f32 %v413_v59, %v363_v27  ;;  %v339_v4 = vpop.f32.mrf.mxu0 }
 0x1cf   :  { %v389_v6 = vpop.f32.mrf.mxu1  ;;  %v528_v7 = vmul.f32 %v831_v63, %v1146_v51  ;;  %v1162_v9 = vpop.eup %832  ;;  %vm533_vm15 = vweird.f32 %v831_v63 }
 0x1d0   :  { %834 = vrcp.f32 %v1152_v30  ;;  %v1156_v8 = vadd.f32 %v389_v6, %v339_v4  ;;  %vm534_vm1 = vmor %vm532_vm0, %vm533_vm15  ;;  %v468_v14 = vmul.f32 %v1162_v9, %v1149_v58  ;;  %v553_v44 = vand.u32 2147483648, %v1152_v30 }
 0x1d1   :  { %v529_v0 = vsub.f32 1.0, %v528_v7  ;;  %v551_v49 = vand.u32 2147483647, %v1152_v30  ;;  %vm547_vm4 = vweird.f32 %v1152_v30  ;;  %vm473_vm11 = vweird.f32 %v1162_v9 }
 0x1d2   :  { %836 = vrcp.f32 %v1156_v8  ;;  %v469_v17 = vsub.f32 1.0, %v468_v14  ;;  %v433_v54 = vand.u32 2147483648, %v1156_v8  ;;  %v431_v36 = vand.u32 2147483647, %v1156_v8  ;;  %vm474_vm13 = vmor %vm472_vm12, %vm473_vm11 }
 0x1d3   :  { %v530_v11 = vmul.f32 %v831_v63, %v529_v0  ;;  %838 = vrcp.f32 %v1158_v33  ;;  %v554_v59 = vor.u32 1.1754944e-38, %v553_v44  ;;  %vm552_vm7 = vcmp.eq.f32.partialorder %v551_v49, 8.507059e+37 }
 0x1d4   :  { %840 = vrcp.f32 %v1171_v61  ;;  %vm427_vm8 = vweird.f32 %v1156_v8  ;;  %v434_v12 = vor.u32 1.1754944e-38, %v433_v54  ;;  %vm432_vm10 = vcmp.eq.f32.partialorder %v431_v36, 8.507059e+37 }
 0x1d5   :  { %v531_v13 = vadd.f32 %v831_v63, %v530_v11  ;;  %vm487_vm0 = vweird.f32 %v1158_v33 }
 0x1d6   :  { %v835_v22 = vpop.eup %834  ;;  %v366_v25 = vpop.f32.mrf.mxu2 }
 0x1d7   :  { %v416_v28 = vpop.f32.mrf.mxu3  ;;  %v535_v52 = vsel %vm534_vm1, %v831_v63, %v531_v13  ;;  %v543_v53 = vmul.f32 %v835_v22, %v1152_v30  ;;  %vm548_vm3 = vweird.f32 %v835_v22  ;;  %v470_v63 = vmul.f32 %v1162_v9, %v469_v17 }
 0x1d8   :  { %v837_v31 = vpop.eup %836  ;;  %v540_v39 = vsel %vm537_vm2, %v539_v42, %v535_v52  ;;  %vm549_vm6 = vmor %vm547_vm4, %vm548_vm3  ;;  %v1188_v42 = vadd.f32 %v416_v28, %v366_v25 }
 0x1d9   :  { %624 = vperm.xlu1 %779, %v540_v39   ;;  %v544_v15 = vsub.f32 1.0, %v543_v53  ;;  %v423_v16 = vmul.f32 %v837_v31, %v1156_v8  ;;  %v1174_v21 = vpop.eup %838  ;;  %vm428_vm5 = vweird.f32 %v837_v31  ;;  %v478_v39 = vand.u32 2147483648, %v1149_v58 }
 0x1da   :  { %v483_v4 = vmul.f32 %v1174_v21, %v1158_v33  ;;  %vm429_vm9 = vmor %vm427_vm8, %vm428_vm5  ;;  %v841_v53 = vpop.eup %840  ;;  %vm488_vm15 = vweird.f32 %v1174_v21  ;;  %vm517_vm8 = vweird.f32 %v1171_v61  ;;  %vm562_vm12 = vweird.f32 %v1188_v42 }
 0x1db   :  { %v545_v47 = vmul.f32 %v835_v22, %v544_v15  ;;  %v424_v24 = vsub.f32 1.0, %v423_v16  ;;  %v476_v15 = vand.u32 2147483647, %v1149_v58  ;;  %v479_v44 = vor.u32 1.1754944e-38, %v478_v39  ;;  %vm489_vm2 = vmor %vm487_vm0, %vm488_vm15 }
 0x1dc   :  { %v484_v52 = vsub.f32 1.0, %v483_v4  ;;  %v521_v39 = vand.u32 2147483647, %v1171_v61 }
 0x1dd   :  { %v546_v57 = vadd.f32 %v835_v22, %v545_v47  ;;  %v425_v27 = vmul.f32 %v837_v31, %v424_v24  ;;  %vm477_vm14 = vcmp.eq.f32.partialorder %v476_v15, 8.507059e+37 }
 0x1de   :  { %v369_v37 = vpop.f32.mrf.mxu2  ;;  %v485_v25 = vmul.f32 %v1174_v21, %v484_v52 }
 0x1df   :  { %v419_v6 = vpop.f32.mrf.mxu3  ;;  %v550_v7 = vsel %vm549_vm6, %v835_v22, %v546_v57  ;;  %v426_v0 = vadd.f32 %v837_v31, %v425_v27  ;;  %v471_v22 = vadd.f32 %v1162_v9, %v470_v63 }
 0x1e0   :  { %v1185_v3 = vadd.f32 %v419_v6, %v369_v37  ;;  %v555_v11 = vsel %vm552_vm7, %v554_v59, %v550_v7  ;;  %v486_v49 = vadd.f32 %v1174_v21, %v485_v25  ;;  %v491_v59 = vand.u32 2147483647, %v1158_v33 }
 0x1e1   :  { %629 = vperm.xlu0 %778, %v555_v11   ;;  %v430_v13 = vsel %vm429_vm9, %v837_v31, %v426_v0  ;;  %v475_v28 = vsel %vm474_vm13, %v1162_v9, %v471_v22  ;;  %v513_v31 = vmul.f32 %v841_v53, %v1171_v61  ;;  %v493_v9 = vand.u32 2147483648, %v1158_v33 }
 0x1e2   :  { %842 = vrcp.f32 %v1185_v3  ;;  %v435_v14 = vsel %vm432_vm10, %v434_v12, %v430_v13  ;;  %v480_v47 = vsel %vm477_vm14, %v479_v44, %v475_v28  ;;  %v583_v27 = vand.u32 2147483648, %v1185_v3 }
 0x1e3   :  { %589 = vperm.xlu2 %777, %v435_v14   ;;  %844 = vrcp.f32 %v1188_v42  ;;  %v514_v54 = vsub.f32 1.0, %v513_v31  ;;  %v581_v37 = vand.u32 2147483647, %v1185_v3  ;;  %v490_v63 = vsel %vm489_vm2, %v1174_v21, %v486_v49 }
 0x1e4   :  { %vm577_vm3 = vweird.f32 %v1185_v3  ;;  %v584_v0 = vor.u32 1.1754944e-38, %v583_v27  ;;  %v494_v11 = vor.u32 1.1754944e-38, %v493_v9  ;;  %vm492_vm6 = vcmp.eq.f32.partialorder %v491_v59, 8.507059e+37 }
 0x1e5   :  { %v515_v6 = vmul.f32 %v841_v53, %v514_v54  ;;  %vm582_vm5 = vcmp.eq.f32.partialorder %v581_v37, 8.507059e+37  ;;  %vm518_vm7 = vweird.f32 %v841_v53  ;;  %v523_v21 = vand.u32 2147483648, %v1171_v61 }
 0x1e6   :  { %v495_v14 = vsel %vm492_vm6, %v494_v11, %v490_v63  ;;  %vm519_vm9 = vmor %vm517_vm8, %vm518_vm7  ;;  %vm522_vm10 = vcmp.eq.f32.partialorder %v521_v39, 8.507059e+37  ;;  %v568_v44 = vand.u32 2147483648, %v1188_v42 }
 0x1e7   :  { %v516_v52 = vadd.f32 %v841_v53, %v515_v6  ;;  %v524_v28 = vor.u32 1.1754944e-38, %v523_v21 }
 0x1e8   :  { %v843_v16 = vpop.eup %842  ;;  %v569_v49 = vor.u32 1.1754944e-38, %v568_v44 }
 0x1e9   :  { %v573_v17 = vmul.f32 %v843_v16, %v1185_v3  ;;  %v845_v57 = vpop.eup %844  ;;  %vm578_vm1 = vweird.f32 %v843_v16  ;;  %v520_v15 = vsel %vm519_vm9, %v841_v53, %v516_v52 }
 0x1ea   :  { %v558_v7 = vmul.f32 %v845_v57, %v1188_v42  ;;  %vm579_vm4 = vmor %vm577_vm3, %vm578_vm1  ;;  %v525_v31 = vsel %vm522_vm10, %v524_v28, %v520_v15  ;;  %vm563_vm11 = vweird.f32 %v845_v57 }
 0x1eb   :  { %604 = vperm.xlu2 %777, %v480_v47   ;;  %v574_v24 = vsub.f32 1.0, %v573_v17  ;;  %v566_v17 = vand.u32 2147483647, %v1188_v42  ;;  %vm564_vm13 = vmor %vm562_vm12, %vm563_vm11 }
 0x1ec   :  { %v559_v22 = vsub.f32 1.0, %v558_v7 }
 0x1ed   :  { %v575_v36 = vmul.f32 %v843_v16, %v574_v24  ;;  %vm567_vm14 = vcmp.eq.f32.partialorder %v566_v17, 8.507059e+37 }
 0x1ee   :  { %v560_v25 = vmul.f32 %v845_v57, %v559_v22 }
 0x1ef   :  { %v576_v4 = vadd.f32 %v843_v16, %v575_v36 }
 0x1f1   :  { %v580_v12 = vsel %vm579_vm4, %v843_v16, %v576_v4  ;;  %v561_v16 = vadd.f32 %v845_v57, %v560_v25 }
 0x1f2   :  { %v585_v13 = vsel %vm582_vm5, %v584_v0, %v580_v12 }
 0x1f3   :  { %639 = vperm.xlu1 %779, %v585_v13   ;;  %609 = vperm.xlu2 %777, %v495_v14   ;;  %v565_v47 = vsel %vm564_vm13, %v845_v57, %v561_v16 }
 0x1f4   :  { %v570_v24 = vsel %vm567_vm14, %v569_v49, %v565_v47 }
 0x1fb   :  { %619 = vperm.xlu2 %777, %v525_v31  }
 0x203   :  { %634 = vperm.xlu2 %777, %v570_v24  }
 0x21b   :  { %v595_v53 = vpop.permute.xlu0 %594 }
 0x21c   :  { %v644_v54 = vmul.f32 %v1041_v40, %v595_v53  ;;  %v645_v27 = vmul.f32 %v1043_v45, %v595_v53  ;;  %v687_v9 = vmul.f32 %v595_v53, %v1125_v50 }
 0x21e   :  { %666 = vst [vmem:[%s1352_s3 + $0x10] sm:$0xff] %v644_v54 }
 0x21f   :  { %667 = vst [vmem:[%s1352_s3 + $0x18] sm:$0xff] %v645_v27 }
 0x220   :  { %698 = vst [vmem:[%s1353_s4 + $0x8] sm:$0xff] %v687_v9 }
 0x223   :  { %v600_v57 = vpop.permute.xlu1 %599 }
 0x224   :  { %v646_v36 = vmul.f32 %v1049_v20, %v600_v57  ;;  %v647_v40 = vmul.f32 %v1051_v48, %v600_v57  ;;  %v688_v45 = vmul.f32 %v600_v57, %v1128_v56 }
 0x226   :  { %668 = vst [vmem:[%s1352_s3 + $0x20] sm:$0xff] %v646_v36 }
 0x227   :  { %669 = vst [vmem:[%s1352_s3 + $0x28] sm:$0xff] %v647_v40 }
 0x228   :  { %699 = vst [vmem:[%s1353_s4 + $0x10] sm:$0xff] %v688_v45 }
 0x23b   :  { %v615_v50 = vpop.permute.xlu1 %614 }
 0x23c   :  { %v652_v37 = vmul.f32 %v1073_v29, %v615_v50  ;;  %v653_v20 = vmul.f32 %v1075_v5, %v615_v50  ;;  %v691_v48 = vmul.f32 %v615_v50, %v1139_v35 }
 0x23d   :  { %v590_v56 = vpop.permute.xlu2 %589 }
 0x23e   :  { %674 = vst [vmem:[%s1352_s3 + $0x50] sm:$0xff] %v652_v37  ;;  %v642_v59 = vmul.f32 %v1107_v62, %v590_v56  ;;  %v643_v63 = vmul.f32 %v1109_v43, %v590_v56  ;;  %v686_v4 = vmul.f32 %v590_v56, %v1156_v8 }
 0x23f   :  { %675 = vst [vmem:[%s1352_s3 + $0x58] sm:$0xff] %v653_v20 }
 0x240   :  { %702 = vst [vmem:[%s1353_s4 + $0x28] sm:$0xff] %v691_v48 }
 0x241   :  { %664 = vst [vmem:[%s1352_s3] sm:$0xff] %v642_v59 }
 0x242   :  { %665 = vst [vmem:[%s1352_s3 + $0x8] sm:$0xff] %v643_v63 }
 0x243   :  { %697 = vst [vmem:[%s1353_s4] sm:$0xff] %v686_v4 }
 0x245   :  { %v605_v29 = vpop.permute.xlu2 %604 }
 0x246   :  { %v648_v5 = vmul.f32 %v1057_v23, %v605_v29  ;;  %v649_v62 = vmul.f32 %v1059_v55, %v605_v29  ;;  %v689_v43 = vmul.f32 %v605_v29, %v1149_v58 }
 0x248   :  { %670 = vst [vmem:[%s1352_s3 + $0x30] sm:$0xff] %v648_v5 }
 0x249   :  { %671 = vst [vmem:[%s1352_s3 + $0x38] sm:$0xff] %v649_v62 }
 0x24a   :  { %700 = vst [vmem:[%s1353_s4 + $0x18] sm:$0xff] %v689_v43 }
 0x24b   :  { %v625_v35 = vpop.permute.xlu1 %624 }
 0x24c   :  { %v656_v8 = vmul.f32 %v1089_v41, %v625_v35  ;;  %v657_v23 = vmul.f32 %v1091_v19, %v625_v35  ;;  %v693_v55 = vmul.f32 %v625_v35, %v1146_v51 }
 0x24d   :  { %v610_v58 = vpop.permute.xlu2 %609 }
 0x24e   :  { %678 = vst [vmem:[%s1352_s3 + $0x70] sm:$0xff] %v656_v8  ;;  %v650_v6 = vmul.f32 %v1065_v26, %v610_v58  ;;  %v651_v7 = vmul.f32 %v1067_v60, %v610_v58  ;;  %v690_v0 = vmul.f32 %v610_v58, %v1158_v33 }
 0x24f   :  { %679 = vst [vmem:[%s1352_s3 + $0x78] sm:$0xff] %v657_v23 }
 0x250   :  { %704 = vst [vmem:[%s1353_s4 + $0x38] sm:$0xff] %v693_v55 }
 0x251   :  { %672 = vst [vmem:[%s1352_s3 + $0x40] sm:$0xff] %v650_v6 }
 0x252   :  { %673 = vst [vmem:[%s1352_s3 + $0x48] sm:$0xff] %v651_v7 }
 0x253   :  { %701 = vst [vmem:[%s1353_s4 + $0x20] sm:$0xff] %v690_v0  ;;  %v630_v26 = vpop.permute.xlu0 %629 }
 0x254   :  { %v658_v60 = vmul.f32 %v1099_v34, %v630_v26  ;;  %v659_v41 = vmul.f32 %v1101_v38, %v630_v26  ;;  %v694_v19 = vmul.f32 %v630_v26, %v1152_v30 }
 0x255   :  { %v620_v51 = vpop.permute.xlu2 %619 }
 0x256   :  { %680 = vst [vmem:[%s1352_s3 + $0x80] sm:$0xff] %v658_v60  ;;  %v654_v33 = vmul.f32 %v1081_v32, %v620_v51  ;;  %v655_v11 = vmul.f32 %v1083_v10, %v620_v51  ;;  %v692_v12 = vmul.f32 %v620_v51, %v1171_v61 }
 0x257   :  { %681 = vst [vmem:[%s1352_s3 + $0x88] sm:$0xff] %v659_v41 }
 0x258   :  { %705 = vst [vmem:[%s1353_s4 + $0x40] sm:$0xff] %v694_v19 }
 0x259   :  { %676 = vst [vmem:[%s1352_s3 + $0x60] sm:$0xff] %v654_v33 }
 0x25a   :  { %677 = vst [vmem:[%s1352_s3 + $0x68] sm:$0xff] %v655_v11 }
 0x25b   :  { %703 = vst [vmem:[%s1353_s4 + $0x30] sm:$0xff] %v692_v12 }
 0x25d   :  { %v635_v32 = vpop.permute.xlu2 %634 }
 0x25e   :  { %v660_v10 = vmul.f32 %v1112_v18, %v635_v32  ;;  %v661_v34 = vmul.f32 %v1115_v46, %v635_v32  ;;  %v695_v38 = vmul.f32 %v635_v32, %v1188_v42 }
 0x260   :  { %682 = vst [vmem:[%s1352_s3 + $0x90] sm:$0xff] %v660_v10 }
 0x261   :  { %683 = vst [vmem:[%s1352_s3 + $0x98] sm:$0xff] %v661_v34 }
 0x262   :  { %706 = vst [vmem:[%s1353_s4 + $0x48] sm:$0xff] %v695_v38 }
 0x265   :  { %v640_v30 = vpop.permute.xlu1 %639 }
 0x266   :  { %v662_v61 = vmul.f32 %v1119_v1, %v640_v30  ;;  %v663_v18 = vmul.f32 %v1121_v2, %v640_v30  ;;  %v696_v46 = vmul.f32 %v640_v30, %v1185_v3 }
 0x268   :  { %684 = vst [vmem:[%s1352_s3 + $0xa0] sm:$0xf] %v662_v61 }
 0x269   :  { %685 = vst [vmem:[%s1352_s3 + $0xa8] sm:$0xf] %v663_v18 }
 0x26a   :  { %707 = vst [vmem:[%s1353_s4 + $0x50] sm:$0xf] %v696_v46 }
 0x26b   :  { %716 = vsyncpa [#allocation3], 1 }

</bundles_post_ra>
